<compile_context>
chip_gen: v5e
topology: v5e:2x2
jax: 0.10.0
libtpu: 0.0.40
codegen_flags: <defaults>
</compile_context>

<pallas_src>
import functools

import jax
import jax.numpy as jnp
from jax.experimental import pallas as pl
from jax.experimental.pallas import tpu as pltpu


def _round_up(x, m):
    return (x + m - 1) // m * m


# --------------------------------------------------------------------------
# Trace-time hardware query: physical VMEM per core (fallback = 64 MiB, the
# v7x per-TensorCore size, i.e. the most conservative of the three gens).
# --------------------------------------------------------------------------
def _physical_vmem_bytes():
    try:
        info = pltpu.get_tpu_info()
        for attr in ("vmem_capacity_bytes", "vmem_bytes", "vmem_size_bytes"):
            v = getattr(info, attr, None)
            if v:
                return int(v)
    except Exception:
        pass
    return 64 << 20


_PHYS_VMEM = _physical_vmem_bytes()
# Never hand the compiler the whole physical VMEM (headroom for internal
# scratch / semaphores).  ~54 MiB on v7x, ~100 MiB on v5e/v6e.
_VMEM_LIMIT_CAP = min(int(_PHYS_VMEM * 0.85), 100 << 20)
# Budget below which W1/W2 are kept fully resident in VMEM (fast path):
# ~40 MiB on v7x, ~80 MiB on v5e/v6e.
_RESIDENT_BUDGET = int(_PHYS_VMEM * 0.62)


# --------------------------------------------------------------------------
# Kernels
# --------------------------------------------------------------------------
def _ffn_resident_kernel(x_ref, w1_ref, b1_ref, w2_ref, b2_ref, o_ref):
    """Fast path: full W1/W2 resident in VMEM, 1-D grid over token tiles."""
    h = jnp.dot(x_ref[...], w1_ref[...], preferred_element_type=jnp.float32)
    h = jnp.maximum(h + b1_ref[...].astype(jnp.float32), 0.0)      # ReLU
    # (dropout: identity in eval mode)
    y = jnp.dot(h.astype(w2_ref.dtype), w2_ref[...],
                preferred_element_type=jnp.float32)
    o_ref[...] = (y + b2_ref[...].astype(jnp.float32)).astype(o_ref.dtype)


def _ffn_streamed_kernel(x_ref, w1_ref, b1_ref, w2_ref, b2_ref, o_ref,
                         acc_ref):
    """Streamed path: 2-D grid (token tile i, d_ff chunk f), f32 accumulator
    resident across the f axis."""
    f = pl.program_id(1)

    @pl.when(f == 0)
    def _():
        acc_ref[...] = jnp.zeros_like(acc_ref)

    h = jnp.dot(x_ref[...], w1_ref[...], preferred_element_type=jnp.float32)
    h = jnp.maximum(h + b1_ref[...].astype(jnp.float32), 0.0)      # ReLU
    # (dropout: identity in eval mode)
    acc_ref[...] += jnp.dot(h.astype(w2_ref.dtype), w2_ref[...],
                            preferred_element_type=jnp.float32)

    @pl.when(f == pl.num_programs(1) - 1)
    def _():
        o_ref[...] = (acc_ref[...] + b2_ref[...].astype(jnp.float32)
                      ).astype(o_ref.dtype)


# --------------------------------------------------------------------------
# Tile / path planning (all static, trace-time Python)
# --------------------------------------------------------------------------
def _plan(n_tokens, dm_p, dff_p, isz, wsz, osz, tile_n, tile_ff):
    def n_tiles(tn):
        return _round_up(n_tokens, tn) // tn

    # ---- token-tile candidates (largest first, MXU-256-friendly) ----------
    if tile_n is not None:
        cands_n = [tile_n]
    elif n_tokens >= 256:
        cands_n = [c for c in (1024, 512, 256, 128)
                   if c <= _round_up(n_tokens, 256)]
        # Guarantee >= 2 token tiles so the "parallel" axis can shard across
        # v7x's two TensorCores (harmless on single-TC v5e / v6e).
        multi = [c for c in cands_n if n_tiles(c) >= 2]
        cands_n = multi or cands_n[-1:]
    else:
        cands_n = [_round_up(max(n_tokens, 1), 8)]

    def resident_bytes(tn):
        return int(1.15 * ((2 * dm_p * dff_p + dm_p + dff_p) * wsz   # weights
                           + 2 * tn * dm_p * (isz + osz)             # x / out
                           + 2 * tn * dff_p * 4))                    # h (f32)

    def streamed_bytes(tn, tf):
        return int(1.15 * (2 * tn * dm_p * isz        # x tiles
                           + 2 * dm_p * tf * wsz      # w1 chunks
                           + 2 * tf * wsz             # b1 chunks
                           + 2 * tf * dm_p * wsz      # w2 chunks
                           + 2 * dm_p * wsz           # b2
                           + 2 * tn * dm_p * osz      # out tiles
                           + tn * dm_p * 4            # f32 accumulator
                           + 2 * tn * tf * 4))        # h intermediate

    force_streamed = tile_ff is not None and tile_ff < dff_p
    force_resident = tile_ff is not None and tile_ff >= dff_p

    if not force_streamed:
        for tn in cands_n:
            b = resident_bytes(tn)
            if force_resident or b <= _RESIDENT_BUDGET:
                return "resident", tn, dff_p, b

    if force_streamed:
        cands_f = [tile_ff]
    else:
        cands_f = [t for t in (512, 256, 128) if dff_p % t == 0]
    for tn in cands_n:
        for tf in cands_f:
            b = streamed_bytes(tn, tf)
            if b <= _VMEM_LIMIT_CAP:
                return "streamed", tn, tf, b
    tn, tf = cands_n[-1], cands_f[-1]
    return "streamed", tn, tf, streamed_bytes(tn, tf)


def _maybe_pad(a, target_shape):
    pads = tuple((0, t - s) for s, t in zip(a.shape, target_shape))
    if any(p for _, p in pads):
        a = jnp.pad(a, pads)
    return a


def _maybe_cast(a, dt):
    return a if a.dtype == dt else a.astype(dt)


def prepare_params(w1, b1, w2, b2, dtype=None):
    """Pad (and optionally cast) the weights once, OUTSIDE the per-call path.
    Pre-aligned params make the jitted wrapper skip all per-call pads/casts."""
    d_model, d_ff = w1.shape
    dm_p, dff_p = _round_up(d_model, 128), _round_up(d_ff, 128)
    w1 = jnp.pad(w1, ((0, dm_p - d_model), (0, dff_p - d_ff)))
    w2 = jnp.pad(w2, ((0, dff_p - d_ff), (0, dm_p - d_model)))
    b1 = jnp.pad(b1, (0, dff_p - d_ff))
    b2 = jnp.pad(b2, (0, dm_p - d_model))
    if dtype is not None:
        w1, w2 = w1.astype(dtype), w2.astype(dtype)
    return w1, b1, w2, b2


# --------------------------------------------------------------------------
# Public wrapper
# --------------------------------------------------------------------------
@functools.partial(jax.jit, static_argnames=("tile_n", "tile_ff", "use_bf16"))
def positionwise_feed_forward(x, w1, b1, w2, b2, *, tile_n=None, tile_ff=None,
                              use_bf16=False):
    """y = w_2(relu(w_1 x + b1)) + b2 over the last axis (eval-mode FFN)."""
    orig_shape = x.shape
    out_dtype = x.dtype
    d_model = orig_shape[-1]
    d_ff = w1.shape[1]

    x2d = x.reshape(-1, d_model)
    n_tokens = x2d.shape[0]

    dm_p = _round_up(d_model, 128)
    dff_p = _round_up(d_ff, 128)

    cdt = jnp.bfloat16 if use_bf16 else x.dtype           # x compute dtype
    wdt = jnp.bfloat16 if use_bf16 else w1.dtype           # weight dtype
    isz = jnp.dtype(cdt).itemsize
    wsz = jnp.dtype(wdt).itemsize
    osz = jnp.dtype(out_dtype).itemsize

    mode, tn, tf, vmem_bytes = _plan(n_tokens, dm_p, dff_p, isz, wsz, osz,
                                     tile_n, tile_ff)
    if mode == "streamed":
        assert dff_p % tf == 0, "tile_ff must divide the padded d_ff"
    n_pad = _round_up(n_tokens, tn)
    n_i = n_pad // tn

    # Zero padding is semantically safe: padded d_model cols of x meet zero W1
    # rows, padded d_ff cols give relu(0)=0 meeting zero W2 rows, padded biases
    # are zero, padded token rows are sliced off.  Pads/casts are skipped when
    # inputs are already aligned (static check) — see prepare_params().
    x_p = _maybe_cast(_maybe_pad(x2d, (n_pad, dm_p)), cdt)
    w1_p = _maybe_cast(_maybe_pad(w1, (dm_p, dff_p)), wdt)
    w2_p = _maybe_cast(_maybe_pad(w2, (dff_p, dm_p)), wdt)
    b1_p = _maybe_pad(b1.reshape(1, -1), (1, dff_p))
    b2_p = _maybe_pad(b2.reshape(1, -1), (1, dm_p))

    vmem_limit = min(max(32 << 20, int(vmem_bytes * 1.4)), _VMEM_LIMIT_CAP)

    bsz = jnp.dtype(b1_p.dtype).itemsize
    w_reads = 1 if mode == "resident" else n_i
    cost = pl.CostEstimate(
        flops=4 * n_pad * dm_p * dff_p,                # two matmuls
        transcendentals=0,
        bytes_accessed=(n_pad * dm_p * (isz + osz)
                        + w_reads * (2 * dm_p * dff_p * wsz
                                     + (dm_p + dff_p) * bsz)),
    )

    if mode == "resident":
        out_p = pl.pallas_call(
            _ffn_resident_kernel,
            out_shape=jax.ShapeDtypeStruct((n_pad, dm_p), out_dtype),
            grid_spec=pltpu.PrefetchScalarGridSpec(
                num_scalar_prefetch=0,
                grid=(n_i,),
                in_specs=[
                    pl.BlockSpec((tn, dm_p), lambda i: (i, 0)),     # x
                    pl.BlockSpec((dm_p, dff_p), lambda i: (0, 0)),  # W1 (resident)
                    pl.BlockSpec((1, dff_p), lambda i: (0, 0)),     # b1
                    pl.BlockSpec((dff_p, dm_p), lambda i: (0, 0)),  # W2 (resident)
                    pl.BlockSpec((1, dm_p), lambda i: (0, 0)),      # b2
                ],
                out_specs=pl.BlockSpec((tn, dm_p), lambda i: (i, 0)),
            ),
            compiler_params=pltpu.CompilerParams(
                dimension_semantics=("parallel",),
                vmem_limit_bytes=vmem_limit,
            ),
            cost_estimate=cost,
        )(x_p, w1_p, b1_p, w2_p, b2_p)
    else:
        out_p = pl.pallas_call(
            _ffn_streamed_kernel,
            out_shape=jax.ShapeDtypeStruct((n_pad, dm_p), out_dtype),
            grid_spec=pltpu.PrefetchScalarGridSpec(
                num_scalar_prefetch=0,
                grid=(n_i, dff_p // tf),
                in_specs=[
                    pl.BlockSpec((tn, dm_p), lambda i, f: (i, 0)),   # x
                    pl.BlockSpec((dm_p, tf), lambda i, f: (0, f)),   # W1 chunk
                    pl.BlockSpec((1, tf), lambda i, f: (0, f)),      # b1 chunk
                    pl.BlockSpec((tf, dm_p), lambda i, f: (f, 0)),   # W2 chunk
                    pl.BlockSpec((1, dm_p), lambda i, f: (0, 0)),    # b2
                ],
                out_specs=pl.BlockSpec((tn, dm_p), lambda i, f: (i, 0)),
                scratch_shapes=[pltpu.VMEM((tn, dm_p), jnp.float32)],
            ),
            compiler_params=pltpu.CompilerParams(
                dimension_semantics=("parallel", "arbitrary"),
                vmem_limit_bytes=vmem_limit,
            ),
            cost_estimate=cost,
        )(x_p, w1_p, b1_p, w2_p, b2_p)

    out2d = out_p[:n_tokens, :d_model]
    return out2d.reshape(orig_shape)


# --------------------------------------------------------------------------
# Reference / init helpers
# --------------------------------------------------------------------------
def init_params(key, d_model, d_ff, dtype=jnp.float32):
    """Deterministic init matching nn.Linear shapes (stored as (d_in, d_out))."""
    k1, k2, k3, k4 = jax.random.split(key, 4)
    lim1 = 1.0 / (d_model ** 0.5)
    lim2 = 1.0 / (d_ff ** 0.5)
    w1 = jax.random.uniform(k1, (d_model, d_ff), dtype, -lim1, lim1)
    b1 = jax.random.uniform(k2, (d_ff,), dtype, -lim1, lim1)
    w2 = jax.random.uniform(k3, (d_ff, d_model), dtype, -lim2, lim2)
    b2 = jax.random.uniform(k4, (d_model,), dtype, -lim2, lim2)
    return w1, b1, w2, b2


def _reference(x, w1, b1, w2, b2):
    return jnp.maximum(x @ w1 + b1, 0.0) @ w2 + b2


def _reference_bf16(x, w1, b1, w2, b2):
    xb, w1b, w2b = (a.astype(jnp.bfloat16) for a in (x, w1, w2))
    h = jnp.dot(xb, w1b, preferred_element_type=jnp.float32) + b1
    h = jnp.maximum(h, 0.0).astype(jnp.bfloat16)
    return jnp.dot(h, w2b, preferred_element_type=jnp.float32) + b2


if __name__ == "__main__":
    key = jax.random.PRNGKey(0)

    # --- 1. small toy case matching the module spec (dims padded inside) ---
    batch, seq, d_model, d_ff = 2, 8, 32, 64
    kx, kp, key = jax.random.split(key, 3)
    x = jax.random.normal(kx, (batch, seq, d_model), jnp.float32)
    w1, b1, w2, b2 = init_params(kp, d_model, d_ff)
    out = jax.block_until_ready(positionwise_feed_forward(x, w1, b1, w2, b2))
    assert out.shape == x.shape
    assert jnp.allclose(out, _reference(x, w1, b1, w2, b2),
                        atol=1e-5, rtol=1e-5), "toy mismatch"

    # --- 2. resident-weight fast path + multi token tile (pre-padded params)
    batch, seq, d_model, d_ff = 4, 128, 256, 1024
    kx, kp, key = jax.random.split(key, 3)
    x = jax.random.normal(kx, (batch, seq, d_model), jnp.float32)
    w1, b1, w2, b2 = init_params(kp, d_model, d_ff)
    pw1, pb1, pw2, pb2 = prepare_params(w1, b1, w2, b2)   # pad once, off-path
    out = jax.block_until_ready(
        positionwise_feed_forward(x, pw1, pb1, pw2, pb2))
    ref = _reference(x, w1, b1, w2, b2)
    assert out.shape == x.shape
    assert jnp.allclose(out, ref, atol=1e-4, rtol=1e-4), "resident mismatch"

    # --- 3. force the streamed (d_ff-chunked, accumulating) path -----------
    out_s = jax.block_until_ready(
        positionwise_feed_forward(x, w1, b1, w2, b2, tile_n=128, tile_ff=128))
    assert jnp.allclose(out_s, ref, atol=1e-4, rtol=1e-4), "streamed mismatch"

    # --- 4. ragged token count / unaligned feature dims --------------------
    batch, seq, d_model, d_ff = 3, 7, 96, 160
    kx, kp, key = jax.random.split(key, 3)
    x = jax.random.normal(kx, (batch, seq, d_model), jnp.float32)
    w1, b1, w2, b2 = init_params(kp, d_model, d_ff)
    out = jax.block_until_ready(positionwise_feed_forward(x, w1, b1, w2, b2))
    assert out.shape == x.shape
    assert jnp.allclose(out, _reference(x, w1, b1, w2, b2),
                        atol=1e-5, rtol=1e-5), "ragged mismatch"

    # --- 5. opt-in bf16 MXU path (f32 accumulation) -------------------------
    batch, seq, d_model, d_ff = 4, 128, 256, 1024
    kx, kp, key = jax.random.split(key, 3)
    x = jax.random.normal(kx, (batch, seq, d_model), jnp.float32)
    w1, b1, w2, b2 = init_params(kp, d_model, d_ff)
    out = jax.block_until_ready(
        positionwise_feed_forward(x, w1, b1, w2, b2, use_bf16=True))
    ref_bf = _reference_bf16(x, w1, b1, w2, b2)
    assert out.shape == x.shape
    assert jnp.allclose(out, ref_bf, atol=1e-2, rtol=1e-2), "bf16 mismatch"

    print("KERNEL_OK")
</pallas_src>

<mosaic_0001>
module attributes {stable_mosaic.version = 11 : i64} {
  func.func @_ffn_resident_kernel(%arg0: i32, %arg1: memref<16x128xf32, #tpu.memory_space<vmem>>, %arg2: memref<128x128xf32, #tpu.memory_space<vmem>>, %arg3: memref<1x128xf32, #tpu.memory_space<vmem>>, %arg4: memref<128x128xf32, #tpu.memory_space<vmem>>, %arg5: memref<1x128xf32, #tpu.memory_space<vmem>>, %arg6: memref<16x128xf32, #tpu.memory_space<vmem>>) attributes {dimension_semantics = [#tpu.dimension_semantics<parallel>], iteration_bounds = array<i64: 1>, scalar_prefetch = 0 : i64, scratch_operands = 0 : i64, tpu.core_type = #tpu.core_type<tc>, window_params = [{transform_indices = @transform_0, window_bounds = array<i64: 16, 128>}, {pipeline_mode = #tpu.pipeline_mode<synchronous>, transform_indices = @transform_1, window_bounds = array<i64: 128, 128>}, {pipeline_mode = #tpu.pipeline_mode<synchronous>, transform_indices = @transform_2, window_bounds = array<i64: 1, 128>}, {pipeline_mode = #tpu.pipeline_mode<synchronous>, transform_indices = @transform_3, window_bounds = array<i64: 128, 128>}, {pipeline_mode = #tpu.pipeline_mode<synchronous>, transform_indices = @transform_4, window_bounds = array<i64: 1, 128>}, {transform_indices = @transform_5, window_bounds = array<i64: 16, 128>}]} {
    %c0 = arith.constant 0 : index
    %c0_0 = arith.constant 0 : index
    %0 = vector.load %arg1[%c0, %c0_0] : memref<16x128xf32, #tpu.memory_space<vmem>>, vector<16x128xf32>
    %c0_1 = arith.constant 0 : index
    %c0_2 = arith.constant 0 : index
    %1 = vector.load %arg2[%c0_1, %c0_2] : memref<128x128xf32, #tpu.memory_space<vmem>>, vector<128x128xf32>
    %cst = arith.constant dense<0.000000e+00> : vector<16x128xf32>
    %2 = tpu.matmul %0, %1, %cst {dimension_numbers = #tpu.dot_dimension_numbers<[1], [0], [0], [1], [0, 0, 1, 1], [], []>} : vector<16x128xf32>, vector<128x128xf32>, vector<16x128xf32> -> vector<16x128xf32>
    %c0_3 = arith.constant 0 : index
    %c0_4 = arith.constant 0 : index
    %3 = vector.load %arg3[%c0_3, %c0_4] : memref<1x128xf32, #tpu.memory_space<vmem>>, vector<1x128xf32>
    %4 = vector.broadcast %3 : vector<1x128xf32> to vector<16x128xf32>
    %5 = arith.addf %2, %4 : vector<16x128xf32>
    %cst_5 = arith.constant 0.000000e+00 : f32
    %6 = vector.broadcast %cst_5 : f32 to vector<16x128xf32>
    %7 = arith.maximumf %5, %6 : vector<16x128xf32>
    %c0_6 = arith.constant 0 : index
    %c0_7 = arith.constant 0 : index
    %8 = vector.load %arg4[%c0_6, %c0_7] : memref<128x128xf32, #tpu.memory_space<vmem>>, vector<128x128xf32>
    %cst_8 = arith.constant dense<0.000000e+00> : vector<16x128xf32>
    %9 = tpu.matmul %7, %8, %cst_8 {dimension_numbers = #tpu.dot_dimension_numbers<[1], [0], [0], [1], [0, 0, 1, 1], [], []>} : vector<16x128xf32>, vector<128x128xf32>, vector<16x128xf32> -> vector<16x128xf32>
    %c0_9 = arith.constant 0 : index
    %c0_10 = arith.constant 0 : index
    %10 = vector.load %arg5[%c0_9, %c0_10] : memref<1x128xf32, #tpu.memory_space<vmem>>, vector<1x128xf32>
    %11 = vector.broadcast %10 : vector<1x128xf32> to vector<16x128xf32>
    %12 = arith.addf %9, %11 : vector<16x128xf32>
    %c0_11 = arith.constant 0 : index
    %c0_12 = arith.constant 0 : index
    %13 = vector.load %arg6[%c0_11, %c0_12] : memref<16x128xf32, #tpu.memory_space<vmem>>, vector<16x128xf32>
    tpu.vector_store %arg6[%c0_11, %c0_12], %12 {strides = array<i32>} : memref<16x128xf32, #tpu.memory_space<vmem>>, vector<16x128xf32>,
    return
  }
  func.func @transform_0(%arg0: i32) -> (i32, i32) {
    %c0_i32 = arith.constant 0 : i32
    %c0_i32_0 = arith.constant 0 : i32
    return %arg0, %c0_i32 : i32, i32
  }
  func.func @transform_1(%arg0: i32) -> (i32, i32) {
    %c0_i32 = arith.constant 0 : i32
    %c0_i32_0 = arith.constant 0 : i32
    %c0_i32_1 = arith.constant 0 : i32
    return %c0_i32, %c0_i32_0 : i32, i32
  }
  func.func @transform_2(%arg0: i32) -> (i32, i32) {
    %c0_i32 = arith.constant 0 : i32
    %c0_i32_0 = arith.constant 0 : i32
    %c0_i32_1 = arith.constant 0 : i32
    return %c0_i32, %c0_i32_0 : i32, i32
  }
  func.func @transform_3(%arg0: i32) -> (i32, i32) {
    %c0_i32 = arith.constant 0 : i32
    %c0_i32_0 = arith.constant 0 : i32
    %c0_i32_1 = arith.constant 0 : i32
    return %c0_i32, %c0_i32_0 : i32, i32
  }
  func.func @transform_4(%arg0: i32) -> (i32, i32) {
    %c0_i32 = arith.constant 0 : i32
    %c0_i32_0 = arith.constant 0 : i32
    %c0_i32_1 = arith.constant 0 : i32
    return %c0_i32, %c0_i32_0 : i32, i32
  }
  func.func @transform_5(%arg0: i32) -> (i32, i32) {
    %c0_i32 = arith.constant 0 : i32
    %c0_i32_0 = arith.constant 0 : i32
    return %arg0, %c0_i32 : i32, i32
  }
}

</mosaic_0001>

<bundles_post_ra>
// kernel: positionwise_feed_forward.1
= control target key start
LH: loop header
LB: loop body
LE: loop exit
PB: predicated region body
PF: predicated region fallthrough
CT: control target
= control target key end

     0   :  { %s294_s1 = inlined_call_operand.vmem [shape: f32[128,128], index: 1, kind: input, shape index: {}]   ;;  %s295_s3 = inlined_call_operand.vmem [shape: f32[128,128], index: 3, kind: input, shape index: {}]   ;;  %s296_s2 = inlined_call_operand.vmem [shape: f32[1,128], index: 2, kind: input, shape index: {}]   ;;  %s297_s0 = inlined_call_operand.vmem [shape: f32[16,128], index: 0, kind: input, shape index: {}]   ;;  %s298_s4 = inlined_call_operand.vmem [shape: f32[1,128], index: 4, kind: input, shape index: {}]   ;;  %s299_s5 = inlined_call_operand.vmem [shape: f32[16,128], index: 5, kind: output, shape index: {}]  }
   0x1   :  { %v37_v0 = vld [vmem:[%s294_s1 + $0x78] sm:$0xff]  ;;  %v36_v1 = vld [vmem:[%s294_s1 + $0x70] sm:$0xff]  ;;  %v35_v2 = vld [vmem:[%s294_s1 + $0x68] sm:$0xff] }
   0x2   :  { %116 = vmatpush.msra.mxu2 %v37_v0  ;;  %42 = vmatpush.msra.mxu0 %v37_v0  ;;  %v34_v3 = vld [vmem:[%s294_s1 + $0x60] sm:$0xff]  ;;  %v33_v4 = vld [vmem:[%s294_s1 + $0x58] sm:$0xff]  ;;  %v81_v6 = vld [vmem:[%s295_s3 + $0x70] sm:$0xff] }
   0x3   :  { %v82_v5 = vld [vmem:[%s295_s3 + $0x78] sm:$0xff]  ;;  %v32_v7 = vld [vmem:[%s294_s1 + $0x50] sm:$0xff]  ;;  %v80_v8 = vld [vmem:[%s295_s3 + $0x68] sm:$0xff] }
   0x4   :  { %117 = vmatpush.msra.mxu2 %v36_v1  ;;  %43 = vmatpush.msra.mxu0 %v36_v1  ;;  %v31_v9 = vld [vmem:[%s294_s1 + $0x48] sm:$0xff]  ;;  %v79_v10 = vld [vmem:[%s295_s3 + $0x60] sm:$0xff]  ;;  %v78_v12 = vld [vmem:[%s295_s3 + $0x58] sm:$0xff] }
   0x5   :  { %132 = vmatpush.msra.mxu3 %v82_v5  ;;  %87 = vmatpush.msra.mxu1 %v82_v5  ;;  %v30_v11 = vld [vmem:[%s294_s1 + $0x40] sm:$0xff]  ;;  %v29_v13 = vld [vmem:[%s294_s1 + $0x38] sm:$0xff]  ;;  %v77_v14 = vld [vmem:[%s295_s3 + $0x50] sm:$0xff] }
   0x6   :  { %118 = vmatpush.msra.mxu2 %v35_v2  ;;  %44 = vmatpush.msra.mxu0 %v35_v2  ;;  %v28_v15 = vld [vmem:[%s294_s1 + $0x30] sm:$0xff]  ;;  %v76_v16 = vld [vmem:[%s295_s3 + $0x48] sm:$0xff]  ;;  %v75_v18 = vld [vmem:[%s295_s3 + $0x40] sm:$0xff] }
   0x7   :  { %133 = vmatpush.msra.mxu3 %v81_v6  ;;  %88 = vmatpush.msra.mxu1 %v81_v6  ;;  %v27_v17 = vld [vmem:[%s294_s1 + $0x28] sm:$0xff]  ;;  %v26_v19 = vld [vmem:[%s294_s1 + $0x20] sm:$0xff]  ;;  %v74_v20 = vld [vmem:[%s295_s3 + $0x38] sm:$0xff] }
   0x8   :  { %119 = vmatpush.msra.mxu2 %v34_v3  ;;  %45 = vmatpush.msra.mxu0 %v34_v3  ;;  %v25_v21 = vld [vmem:[%s294_s1 + $0x18] sm:$0xff]  ;;  %v73_v22 = vld [vmem:[%s295_s3 + $0x30] sm:$0xff]  ;;  %v72_v24 = vld [vmem:[%s295_s3 + $0x28] sm:$0xff] }
   0x9   :  { %134 = vmatpush.msra.mxu3 %v80_v8  ;;  %89 = vmatpush.msra.mxu1 %v80_v8  ;;  %v24_v23 = vld [vmem:[%s294_s1 + $0x10] sm:$0xff]  ;;  %v23_v25 = vld [vmem:[%s294_s1 + $0x8] sm:$0xff]  ;;  %v71_v26 = vld [vmem:[%s295_s3 + $0x20] sm:$0xff] }
   0xa   :  { %120 = vmatpush.msra.mxu2 %v33_v4  ;;  %46 = vmatpush.msra.mxu0 %v33_v4  ;;  %v22_v27 = vld [vmem:[%s294_s1] sm:$0xff]  ;;  %v21_v28 = vld [vmem:[%s297_s0 + $0x8] sm:$0xff]  ;;  %v70_v30 = vld [vmem:[%s295_s3 + $0x18] sm:$0xff] }
   0xb   :  { %135 = vmatpush.msra.mxu3 %v79_v10  ;;  %90 = vmatpush.msra.mxu1 %v79_v10  ;;  %v20_v29 = vld [vmem:[%s297_s0] sm:$0xff]  ;;  %v69_v31 = vld [vmem:[%s295_s3 + $0x10] sm:$0xff]  ;;  %v68_v32 = vld [vmem:[%s295_s3 + $0x8] sm:$0xff] }
   0xc   :  { %121 = vmatpush.msra.mxu2 %v32_v7  ;;  %47 = vmatpush.msra.mxu0 %v32_v7  ;;  %v67_v33 = vld [vmem:[%s295_s3] sm:$0xff] }
   0xd   :  { %136 = vmatpush.msra.mxu3 %v78_v12  ;;  %91 = vmatpush.msra.mxu1 %v78_v12  ;;  %v148_v34 = vld [vmem:[%s296_s2] ss:$0 sm:$0xff] }
   0xe   :  { %122 = vmatpush.msra.mxu2 %v31_v9  ;;  %48 = vmatpush.msra.mxu0 %v31_v9  ;;  %v149_v41 = vld [vmem:[%s298_s4] ss:$0 sm:$0xff] }
   0xf   :  { %137 = vmatpush.msra.mxu3 %v77_v14  ;;  %92 = vmatpush.msra.mxu1 %v77_v14 }
  0x10   :  { %123 = vmatpush.msra.mxu2 %v30_v11  ;;  %49 = vmatpush.msra.mxu0 %v30_v11 }
  0x11   :  { %138 = vmatpush.msra.mxu3 %v76_v16  ;;  %93 = vmatpush.msra.mxu1 %v76_v16 }
  0x12   :  { %124 = vmatpush.msra.mxu2 %v29_v13  ;;  %50 = vmatpush.msra.mxu0 %v29_v13 }
  0x13   :  { %139 = vmatpush.msra.mxu3 %v75_v18  ;;  %94 = vmatpush.msra.mxu1 %v75_v18 }
  0x14   :  { %125 = vmatpush.msra.mxu2 %v28_v15  ;;  %51 = vmatpush.msra.mxu0 %v28_v15 }
  0x15   :  { %140 = vmatpush.msra.mxu3 %v74_v20  ;;  %95 = vmatpush.msra.mxu1 %v74_v20 }
  0x16   :  { %126 = vmatpush.msra.mxu2 %v27_v17  ;;  %52 = vmatpush.msra.mxu0 %v27_v17 }
  0x17   :  { %141 = vmatpush.msra.mxu3 %v73_v22  ;;  %96 = vmatpush.msra.mxu1 %v73_v22 }
  0x18   :  { %127 = vmatpush.msra.mxu2 %v26_v19  ;;  %53 = vmatpush.msra.mxu0 %v26_v19 }
  0x19   :  { %142 = vmatpush.msra.mxu3 %v72_v24  ;;  %97 = vmatpush.msra.mxu1 %v72_v24 }
  0x1a   :  { %128 = vmatpush.msra.mxu2 %v25_v21  ;;  %54 = vmatpush.msra.mxu0 %v25_v21 }
  0x1b   :  { %143 = vmatpush.msra.mxu3 %v71_v26  ;;  %98 = vmatpush.msra.mxu1 %v71_v26 }
  0x1c   :  { %129 = vmatpush.msra.mxu2 %v24_v23  ;;  %55 = vmatpush.msra.mxu0 %v24_v23 }
  0x1d   :  { %144 = vmatpush.msra.mxu3 %v70_v30  ;;  %99 = vmatpush.msra.mxu1 %v70_v30 }
  0x1e   :  { %130 = vmatpush.msra.mxu2 %v23_v25  ;;  %56 = vmatpush.msra.mxu0 %v23_v25 }
  0x1f   :  { %145 = vmatpush.msra.mxu3 %v69_v31  ;;  %100 = vmatpush.msra.mxu1 %v69_v31 }
  0x20   :  { %131 = vmatpush.msra.mxu2 %v22_v27  ;;  %57 = vmatpush.msra.mxu0 %v22_v27 }
  0x21   :  { %61 = vmatmul.f32.vlgmr.msra.gmra.mxu2 %v21_v28  ;;  %58 = vmatmul.f32.vlgmr.msra.gmra.mxu0 %v20_v29 }
  0x22   :  { %146 = vmatpush.msra.mxu3 %v68_v32  ;;  %101 = vmatpush.msra.mxu1 %v68_v32 }
  0x24   :  { %147 = vmatpush.msra.mxu3 %v67_v33  ;;  %102 = vmatpush.msra.mxu1 %v67_v33 }
  0x9e   :  { %v59_v35 = vpop.f32.mrf.mxu0 }
  0x9f   :  { %v60_v36 = vadd.f32 %v148_v34, %v59_v35 }
  0xa1   :  { %v65_v37 = vmax.f32 %v60_v36, 0.0 }
  0xa3   :  { %103 = vmatmul.f32.vlgmr.msra.gmra.mxu1 %v65_v37 }
  0xa4   :  { %v62_v38 = vpop.f32.mrf.mxu2 }
  0xa5   :  { %v63_v39 = vadd.f32 %v148_v34, %v62_v38 }
  0xa7   :  { %v66_v40 = vmax.f32 %v63_v39, 0.0 }
  0xa9   :  { %106 = vmatmul.f32.vlgmr.msra.gmra.mxu3 %v66_v40 }
 0x120   :  { %v104_v42 = vpop.f32.mrf.mxu1 }
 0x121   :  { %v105_v43 = vadd.f32 %v149_v41, %v104_v42 }
 0x123   :  { %110 = vst [vmem:[%s299_s5] sm:$0xff] %v105_v43 }
 0x12c   :  { %v107_v44 = vpop.f32.mrf.mxu3 }
 0x12d   :  { %v108_v45 = vadd.f32 %v149_v41, %v107_v44 }
 0x12f   :  { %111 = vst [vmem:[%s299_s5 + $0x8] sm:$0xff] %v108_v45 }

</bundles_post_ra>
